<compile_context>
chip_gen: v7x
topology: tpu7x:2x2x1
jax: 0.10.0
libtpu: 0.0.40
codegen_flags: <defaults>
</compile_context>

<pallas_src>
import jax
import jax.numpy as jnp
from jax.experimental import pallas as pl
from jax.experimental.pallas import tpu as pltpu


def _round_up(n, m):
    return ((n + m - 1) // m) * m


def _freqs_sin_kernel(ab_ref, rcos_ref, s1_ref, s2_ref, cls_ref, o_ref):
    f32 = jnp.float32
    hi = jax.lax.Precision.HIGHEST

    ab = ab_ref[...]                             # (TB, 2) int32, columns [a | b]
    a = ab[:, 0:1]                               # (TB, 1) int32
    b = ab[:, 1:2]
    tb = ab.shape[0]
    r_pad = rcos_ref.shape[0]

    # --- cos(a*f_k), cos(b*f_k): one-hot row gather from the residue table (MXU) ---
    row_ids = jax.lax.broadcasted_iota(jnp.int32, (tb, r_pad), 1)
    oh_a = (row_ids == a).astype(f32)            # (TB, R_pad)
    oh_b = (row_ids == b).astype(f32)
    rcos = rcos_ref[...]                         # (R_pad, F_pad), zero-padded
    cos_a = jnp.dot(oh_a, rcos, precision=hi, preferred_element_type=f32)  # (TB, F_pad)
    cos_b = jnp.dot(oh_b, rcos, precision=hi, preferred_element_type=f32)

    # --- learned "sin": broadcast-degenerate MLP -> scalar per example (VPU) ---
    # dot(freqs_a, tile(sin_1)) == (a*sum(freqs)) * sin_1_row; sum(freqs) is
    # pre-folded into s1_ref.  Output column-identical -> keep (TB, 1).
    a_f = a.astype(f32)
    b_f = b.astype(f32)
    s1 = s1_ref[...]                             # (1, W) = sum(freqs) * sin_1
    s2 = s2_ref[...]                             # (1, W) = sin_2 as a row
    sin_a = jnp.sum(jnp.maximum(a_f * s1, 0.0) * s2, axis=1, keepdims=True)  # (TB, 1)
    sin_b = jnp.sum(jnp.maximum(b_f * s1, 0.0) * s2, axis=1, keepdims=True)

    # --- angle-addition features; padded lanes multiply zero class-table rows ---
    cos_apb = cos_a * cos_b - sin_a * sin_b      # (TB, F_pad)
    sin_apb = sin_a * cos_b + cos_a * sin_b      # (TB, F_pad)

    # --- single fused K=2*F_pad=256 output matmul (lane-aligned concat) ---
    feat = jnp.concatenate([cos_apb, sin_apb], axis=1)   # (TB, 2*F_pad)
    o_ref[...] = jnp.dot(feat, cls_ref[...], precision=hi,
                         preferred_element_type=f32)


def freqs_sin_param_forward(x, freqs, sin_1, sin_2, p, *, block_b=1024):
    """x: (B, 2) int tokens; freqs: (F,); sin_1: (1, W); sin_2: (W, 1).

    Returns logits of shape (B, p), float32."""
    B = x.shape[0]
    F = freqs.shape[0]
    W = sin_1.shape[1]
    f32 = jnp.float32
    freqs = freqs.astype(f32)

    # ---- parameter-only work, computed once outside the kernel ----
    f_pad = _round_up(F, 128)                 # feature lanes (MXU-aligned concat)
    p_pad = _round_up(p, 128)                 # lane-dense output
    r_pad = _round_up(p, 8)                   # residue rows for the one-hot gather

    # Residue table: rcos[r, k] = cos(r * f_k); zero in padded rows/cols.
    r = jnp.arange(p, dtype=f32)[:, None]
    res_cos = jnp.pad(jnp.cos(r * freqs[None, :]),
                      ((0, r_pad - p), (0, f_pad - F)))               # (R_pad, F_pad)

    # Class table stacked along K: [cos(f_k*c) ; sin(f_k*c)]; zero-padded rows
    # guarantee garbage in padded feature lanes contributes nothing.
    c = jnp.arange(p, dtype=f32)[None, :]
    fc = freqs[:, None]
    cos_c = jnp.pad(jnp.cos(fc * c), ((0, f_pad - F), (0, p_pad - p)))
    sin_c = jnp.pad(jnp.sin(fc * c), ((0, f_pad - F), (0, p_pad - p)))
    cls_tab = jnp.concatenate([cos_c, sin_c], axis=0)                  # (2*F_pad, P_pad)

    s1_eff = (jnp.sum(freqs) * sin_1.astype(f32)).reshape(1, W)        # fold sum(freqs)
    s2_row = sin_2.astype(f32).reshape(1, W)

    # ---- batch tiling: near-equal tiles; >=2 steps when possible (v7x megacore) ----
    b8 = _round_up(max(B, 1), 8)
    n_tiles = max(pl.cdiv(b8, block_b), 1)
    if b8 >= 16:
        n_tiles = max(n_tiles, 2)             # let "parallel" shard across TCs
    tb = _round_up(pl.cdiv(b8, n_tiles), 8)
    b_pad = _round_up(b8, tb)

    ab = x.astype(jnp.int32)
    if b_pad != B:
        ab = jnp.pad(ab, ((0, b_pad - B), (0, 0)))

    out = pl.pallas_call(
        _freqs_sin_kernel,
        out_shape=jax.ShapeDtypeStruct((b_pad, p_pad), f32),
        grid=(b_pad // tb,),
        in_specs=[
            pl.BlockSpec((tb, 2), lambda i: (i, 0)),
            pl.BlockSpec((r_pad, f_pad), lambda i: (0, 0)),
            pl.BlockSpec((1, W), lambda i: (0, 0)),
            pl.BlockSpec((1, W), lambda i: (0, 0)),
            pl.BlockSpec((2 * f_pad, p_pad), lambda i: (0, 0)),
        ],
        out_specs=pl.BlockSpec((tb, p_pad), lambda i: (i, 0)),
        compiler_params=pltpu.CompilerParams(
            dimension_semantics=("parallel",)),
    )(ab, res_cos, s1_eff, s2_row, cls_tab)

    return out[:B, :p]


def _reference(x, freqs, sin_1, sin_2, p):
    """Pure-JAX (float32) translation of the PyTorch forward pass."""
    f32 = jnp.float32
    hi = jax.lax.Precision.HIGHEST
    a = x[:, 0].astype(f32)[:, None]
    b = x[:, 1].astype(f32)[:, None]
    freqs = freqs.astype(f32)
    f = freqs[None, :]
    F = freqs.shape[0]
    W = sin_1.shape[1]
    s1_rep = jnp.broadcast_to(sin_1.astype(f32), (F, W))
    s2_rep = jnp.broadcast_to(sin_2.astype(f32), (W, F))

    def sin_mlp(z):
        h = jnp.maximum(jnp.dot(z, s1_rep, precision=hi), 0.0)
        return jnp.dot(h, s2_rep, precision=hi)

    freqs_a = a * f
    freqs_b = b * f
    sin_a, sin_b = sin_mlp(freqs_a), sin_mlp(freqs_b)
    cos_a, cos_b = jnp.cos(freqs_a), jnp.cos(freqs_b)
    sin_apb = sin_a * cos_b + cos_a * sin_b
    cos_apb = cos_a * cos_b - sin_a * sin_b
    c = jnp.arange(p, dtype=f32)[None, :]
    fc = freqs[:, None]
    return (jnp.dot(cos_apb, jnp.cos(fc * c), precision=hi)
            + jnp.dot(sin_apb, jnp.sin(fc * c), precision=hi))


if __name__ == "__main__":
    p = 29
    n_freqs = 50
    sin_width = 32
    batch = 8

    key = jax.random.PRNGKey(0)
    k_f, k_s1, k_s2, k_x = jax.random.split(key, 4)

    # Parameters: t.nn.init.uniform_ -> U[0, 1).  (The PyTorch __init__ inits
    # sin_1 twice and never sin_2; we init sin_2 uniformly as well.)
    freqs = jax.random.uniform(k_f, (n_freqs,), dtype=jnp.float32)
    sin_1 = jax.random.uniform(k_s1, (1, sin_width), dtype=jnp.float32)
    sin_2 = jax.random.uniform(k_s2, (sin_width, 1), dtype=jnp.float32)
    # Inputs: pairs of residues mod p, shape (batch, 2).
    x = jax.random.randint(k_x, (batch, 2), 0, p, dtype=jnp.int32)

    logits = freqs_sin_param_forward(x, freqs, sin_1, sin_2, p)
    logits = jax.block_until_ready(logits)

    ref = _reference(x, freqs, sin_1, sin_2, p)
    assert logits.shape == (batch, p), logits.shape
    err = float(jnp.max(jnp.abs(logits - ref)))
    scale = float(jnp.max(jnp.abs(ref)))
    assert err <= 3e-2 * scale + 1e-3, (err, scale)
    print("KERNEL_OK")
</pallas_src>

<mosaic_0001>
module attributes {stable_mosaic.version = 11 : i64} {
  func.func @_freqs_sin_kernel(%arg0: i32, %arg1: memref<8x2xi32, #tpu.memory_space<vmem>>, %arg2: memref<32x128xf32, #tpu.memory_space<vmem>>, %arg3: memref<1x32xf32, #tpu.memory_space<vmem>>, %arg4: memref<1x32xf32, #tpu.memory_space<vmem>>, %arg5: memref<256x128xf32, #tpu.memory_space<vmem>>, %arg6: memref<8x128xf32, #tpu.memory_space<vmem>>) attributes {dimension_semantics = [#tpu.dimension_semantics<parallel>], iteration_bounds = array<i64: 1>, scalar_prefetch = 0 : i64, scratch_operands = 0 : i64, tpu.core_type = #tpu.core_type<tc>, window_params = [{transform_indices = @transform_0, window_bounds = array<i64: 8, 2>}, {pipeline_mode = #tpu.pipeline_mode<synchronous>, transform_indices = @transform_1, window_bounds = array<i64: 32, 128>}, {pipeline_mode = #tpu.pipeline_mode<synchronous>, transform_indices = @transform_2, window_bounds = array<i64: 1, 32>}, {pipeline_mode = #tpu.pipeline_mode<synchronous>, transform_indices = @transform_3, window_bounds = array<i64: 1, 32>}, {pipeline_mode = #tpu.pipeline_mode<synchronous>, transform_indices = @transform_4, window_bounds = array<i64: 256, 128>}, {transform_indices = @transform_5, window_bounds = array<i64: 8, 128>}]} {
    %c0 = arith.constant 0 : index
    %c0_0 = arith.constant 0 : index
    %0 = vector.load %arg1[%c0, %c0_0] : memref<8x2xi32, #tpu.memory_space<vmem>>, vector<8x2xi32>
    %1 = vector.extract_strided_slice %0 {offsets = [0, 0], sizes = [8, 1], strides = [1, 1]} : vector<8x2xi32> to vector<8x1xi32>
    %2 = vector.extract_strided_slice %0 {offsets = [0, 1], sizes = [8, 1], strides = [1, 1]} : vector<8x2xi32> to vector<8x1xi32>
    %3 = tpu.iota {dimensions = array<i32: 1>} : vector<8x32xi32>
    %4 = vector.broadcast %1 : vector<8x1xi32> to vector<8x32xi32>
    %5 = arith.cmpi eq, %3, %4 : vector<8x32xi32>
    %6 = arith.extui %5 : vector<8x32xi1> to vector<8x32xi32>
    %7 = arith.sitofp %6 : vector<8x32xi32> to vector<8x32xf32>
    %8 = vector.broadcast %2 : vector<8x1xi32> to vector<8x32xi32>
    %9 = arith.cmpi eq, %3, %8 : vector<8x32xi32>
    %10 = arith.extui %9 : vector<8x32xi1> to vector<8x32xi32>
    %11 = arith.sitofp %10 : vector<8x32xi32> to vector<8x32xf32>
    %c0_1 = arith.constant 0 : index
    %c0_2 = arith.constant 0 : index
    %12 = vector.load %arg2[%c0_1, %c0_2] : memref<32x128xf32, #tpu.memory_space<vmem>>, vector<32x128xf32>
    %cst = arith.constant dense<0.000000e+00> : vector<8x128xf32>
    %13 = tpu.matmul %7, %12, %cst {dimension_numbers = #tpu.dot_dimension_numbers<[1], [0], [0], [1], [0, 0, 1, 1], [], []>, precision = #tpu.contract_precision<fp32>} : vector<8x32xf32>, vector<32x128xf32>, vector<8x128xf32> -> vector<8x128xf32>
    %cst_3 = arith.constant dense<0.000000e+00> : vector<8x128xf32>
    %14 = tpu.matmul %11, %12, %cst_3 {dimension_numbers = #tpu.dot_dimension_numbers<[1], [0], [0], [1], [0, 0, 1, 1], [], []>, precision = #tpu.contract_precision<fp32>} : vector<8x32xf32>, vector<32x128xf32>, vector<8x128xf32> -> vector<8x128xf32>
    %15 = arith.sitofp %1 : vector<8x1xi32> to vector<8x1xf32>
    %16 = arith.sitofp %2 : vector<8x1xi32> to vector<8x1xf32>
    %c0_4 = arith.constant 0 : index
    %c0_5 = arith.constant 0 : index
    %17 = vector.load %arg3[%c0_4, %c0_5] : memref<1x32xf32, #tpu.memory_space<vmem>>, vector<1x32xf32>
    %c0_6 = arith.constant 0 : index
    %c0_7 = arith.constant 0 : index
    %18 = vector.load %arg4[%c0_6, %c0_7] : memref<1x32xf32, #tpu.memory_space<vmem>>, vector<1x32xf32>
    %19 = vector.broadcast %15 : vector<8x1xf32> to vector<8x32xf32>
    %20 = vector.broadcast %17 : vector<1x32xf32> to vector<8x32xf32>
    %21 = arith.mulf %19, %20 : vector<8x32xf32>
    %cst_8 = arith.constant 0.000000e+00 : f32
    %22 = vector.broadcast %cst_8 : f32 to vector<8x32xf32>
    %23 = arith.maximumf %21, %22 : vector<8x32xf32>
    %24 = vector.broadcast %18 : vector<1x32xf32> to vector<8x32xf32>
    %25 = arith.mulf %23, %24 : vector<8x32xf32>
    %cst_9 = arith.constant dense<0.000000e+00> : vector<8xf32>
    %26 = vector.multi_reduction <add>, %25, %cst_9 [1] : vector<8x32xf32> to vector<8xf32>
    %27 = vector.shape_cast %26 : vector<8xf32> to vector<8x1xf32>
    %28 = vector.broadcast %16 : vector<8x1xf32> to vector<8x32xf32>
    %29 = vector.broadcast %17 : vector<1x32xf32> to vector<8x32xf32>
    %30 = arith.mulf %28, %29 : vector<8x32xf32>
    %cst_10 = arith.constant 0.000000e+00 : f32
    %31 = vector.broadcast %cst_10 : f32 to vector<8x32xf32>
    %32 = arith.maximumf %30, %31 : vector<8x32xf32>
    %33 = vector.broadcast %18 : vector<1x32xf32> to vector<8x32xf32>
    %34 = arith.mulf %32, %33 : vector<8x32xf32>
    %cst_11 = arith.constant dense<0.000000e+00> : vector<8xf32>
    %35 = vector.multi_reduction <add>, %34, %cst_11 [1] : vector<8x32xf32> to vector<8xf32>
    %36 = vector.shape_cast %35 : vector<8xf32> to vector<8x1xf32>
    %37 = arith.mulf %13, %14 : vector<8x128xf32>
    %38 = arith.mulf %27, %36 : vector<8x1xf32>
    %39 = vector.broadcast %38 : vector<8x1xf32> to vector<8x128xf32>
    %40 = arith.subf %37, %39 : vector<8x128xf32>
    %41 = vector.broadcast %27 : vector<8x1xf32> to vector<8x128xf32>
    %42 = arith.mulf %41, %14 : vector<8x128xf32>
    %43 = vector.broadcast %36 : vector<8x1xf32> to vector<8x128xf32>
    %44 = arith.mulf %13, %43 : vector<8x128xf32>
    %45 = arith.addf %42, %44 : vector<8x128xf32>
    %46 = tpu.concatenate %40, %45 in 1 : vector<8x128xf32>, vector<8x128xf32> -> vector<8x256xf32>
    %c0_12 = arith.constant 0 : index
    %c0_13 = arith.constant 0 : index
    %47 = vector.load %arg5[%c0_12, %c0_13] : memref<256x128xf32, #tpu.memory_space<vmem>>, vector<256x128xf32>
    %cst_14 = arith.constant dense<0.000000e+00> : vector<8x128xf32>
    %48 = tpu.matmul %46, %47, %cst_14 {dimension_numbers = #tpu.dot_dimension_numbers<[1], [0], [0], [1], [0, 0, 1, 1], [], []>, precision = #tpu.contract_precision<fp32>} : vector<8x256xf32>, vector<256x128xf32>, vector<8x128xf32> -> vector<8x128xf32>
    %c0_15 = arith.constant 0 : index
    %c0_16 = arith.constant 0 : index
    %49 = vector.load %arg6[%c0_15, %c0_16] : memref<8x128xf32, #tpu.memory_space<vmem>>, vector<8x128xf32>
    tpu.vector_store %arg6[%c0_15, %c0_16], %48 {strides = array<i32>} : memref<8x128xf32, #tpu.memory_space<vmem>>, vector<8x128xf32>,
    return
  }
  func.func @transform_0(%arg0: i32) -> (i32, i32) {
    %c0_i32 = arith.constant 0 : i32
    %c0_i32_0 = arith.constant 0 : i32
    return %arg0, %c0_i32 : i32, i32
  }
  func.func @transform_1(%arg0: i32) -> (i32, i32) {
    %c0_i32 = arith.constant 0 : i32
    %c0_i32_0 = arith.constant 0 : i32
    %c0_i32_1 = arith.constant 0 : i32
    return %c0_i32, %c0_i32_0 : i32, i32
  }
  func.func @transform_2(%arg0: i32) -> (i32, i32) {
    %c0_i32 = arith.constant 0 : i32
    %c0_i32_0 = arith.constant 0 : i32
    %c0_i32_1 = arith.constant 0 : i32
    return %c0_i32, %c0_i32_0 : i32, i32
  }
  func.func @transform_3(%arg0: i32) -> (i32, i32) {
    %c0_i32 = arith.constant 0 : i32
    %c0_i32_0 = arith.constant 0 : i32
    %c0_i32_1 = arith.constant 0 : i32
    return %c0_i32, %c0_i32_0 : i32, i32
  }
  func.func @transform_4(%arg0: i32) -> (i32, i32) {
    %c0_i32 = arith.constant 0 : i32
    %c0_i32_0 = arith.constant 0 : i32
    %c0_i32_1 = arith.constant 0 : i32
    return %c0_i32, %c0_i32_0 : i32, i32
  }
  func.func @transform_5(%arg0: i32) -> (i32, i32) {
    %c0_i32 = arith.constant 0 : i32
    %c0_i32_0 = arith.constant 0 : i32
    return %arg0, %c0_i32 : i32, i32
  }
}

</mosaic_0001>

<bundles_post_ra>
// kernel: tpu_custom_call.1
= control target key start
LH: loop header
LB: loop body
LE: loop exit
PB: predicated region body
PF: predicated region fallthrough
CT: control target
= control target key end

     0   :  { %10 = vsyncpa [#allocation3], 0  ;;  %s3619_s0 = inlined_call_operand.vmem [shape: s32[8,2], index: 0, kind: input, shape index: {}]   ;;  %s3620_s1 = inlined_call_operand.hbm [shape: f32[32,128], index: 1, kind: input, shape index: {}]   ;;  %s3621_s2 = inlined_call_operand.vmem [shape: f32[1,32], index: 2, kind: input, shape index: {}]   ;;  %s3622_s3 = inlined_call_operand.vmem [shape: f32[1,32], index: 3, kind: input, shape index: {}]   ;;  %s3623_s4 = inlined_call_operand.hbm [shape: f32[256,128], index: 4, kind: input, shape index: {}]   ;;  %s3624_s5 = inlined_call_operand.hbm [shape: f32[8,128], index: 5, kind: output, shape index: {}]  }
   0x1   :  { %11 = vsyncpa [#allocation6], 0 }
   0x2   :  { %12 = vsyncpa [#allocation4], 0  ;;  %s2780_s18 = smov [#allocation2]   ;;  %s2708_s22 = scalar_lea.hbm %s3620_s1, 512 }
   0x3   :  { %s20_s19 = sshll.u32 %s2780_s18, 4  ;;  %p2709_p0 = scmp.ne.s32.totalorder %s3620_s1, %s2708_s22  ;;  %s21_s19 = int_to_ptr.vmem [resolvable:$true] %s20_s19 }
   0x4   :  { %p2712_p1 = scmp.lt.u32.totalorder %s2708_s22, %s3620_s1 }
   0x6   :  { %p2714_p2 = pnand %p2712_p1, %p2709_p0 }
   0x8   :  { %2717 = shalt.err (!%p2714_p2)
}
   0x9   :  { %s2718_s27 = scalar_lea.vmem %s21_s19, 512  ;;  %p2723_p4 = scmp.lt.s32.totalorder %s21_s19, %s21_s19 }
   0xa   :  { %p2719_p3 = scmp.ne.s32.totalorder %s21_s19, %s2718_s27  ;;  %p2724_p5 = scmp.lt.s32.totalorder %s2718_s27, %s2718_s27 }
   0xc   :  { %p2725_p6 = por %p2724_p5, %p2723_p4 }
   0xe   :  { %p2726_p7 = pnand %p2725_p6, %p2719_p3 }
  0x10   :  { %2729 = shalt.err (!%p2726_p7)
}
  0x11   :  { %s2781_s28 = smov 128   ;;  %s2782_s29 = smov 8  }
  0x12   :  { %26 = dma.hbm_to_vmem [thread:$0]  %s3620_s1, 512, %s21_s19, [#allocation3], %s2781_s28, %s2781_s28, %s2782_s29  }
  0x13   :  { %s2783_s7 = smov [#allocation5]   ;;  %s2730_s11 = scalar_lea.hbm %s3623_s4, 4096 }
  0x14   :  { %s36_s8 = sshll.u32 %s2783_s7, 4  ;;  %p2731_p8 = scmp.ne.s32.totalorder %s3623_s4, %s2730_s11  ;;  %s37_s8 = int_to_ptr.vmem [resolvable:$true] %s36_s8 }
  0x15   :  { %p2734_p9 = scmp.lt.u32.totalorder %s2730_s11, %s3623_s4 }
  0x17   :  { %p2736_p10 = pnand %p2734_p9, %p2731_p8 }
  0x19   :  { %2739 = shalt.err (!%p2736_p10)
}
  0x1a   :  { %s2740_s16 = scalar_lea.vmem %s37_s8, 4096  ;;  %p2745_p12 = scmp.lt.s32.totalorder %s37_s8, %s37_s8 }
  0x1b   :  { %p2741_p11 = scmp.ne.s32.totalorder %s37_s8, %s2740_s16  ;;  %p2746_p13 = scmp.lt.s32.totalorder %s2740_s16, %s2740_s16 }
  0x1d   :  { %p2747_p0 = por %p2746_p13, %p2745_p12 }
  0x1f   :  { %p2748_p1 = pnand %p2747_p0, %p2741_p11 }
  0x21   :  { %2751 = shalt.err (!%p2748_p1)
}
  0x22   :  { %42 = dma.hbm_to_vmem [thread:$0]  %s3623_s4, 4096, %s37_s8, [#allocation6], %s2781_s28, %s2781_s28, %s2782_s29  }
  0x23   :  { %2774 = dma.done.wait [#allocation3], 512  }
  0x24   :  { %2775 = vsyncadd [#allocation3], 4294966784 }
  0x25   :  { %2776 = dma.done.wait [#allocation6], 4096  }
  0x26   :  { %2777 = vsyncadd [#allocation6], 4294963200  ;;  %v2784_v0 = vmov 0   ;;  %v49_v1 = vld [vmem:[%s3619_s0] sm:$0xff]  ;;  %v65_v3 = vld [vmem:[#allocation2 + $0x8] sm:$0xff]  ;;  %v2785_v10 = vmov 0.0|0.0   ;;  %v50_v38 = vlaneseq }
  0x27   :  { %2704 = vset.pattern.permute.xlu0 %v2784_v0  ;;  %2706 = vset.pattern.permute.xlu1 %v2784_v0  ;;  %v64_v2 = vld [vmem:[#allocation2] sm:$0xff]  ;;  %v1045_v4 = vcvt.s32.f32 %v49_v1  ;;  %v76_v6 = vand.u32 4294901760, %v65_v3  ;;  %v66_v11 = vld [vmem:[#allocation2 + $0x10] sm:$0xff]  ;;  %v67_v12 = vld [vmem:[#allocation2 + $0x18] sm:$0xff]  ;;  %v2786_v13 = vmov 1   ;;  %vm2787_vm0 = vmmov 0  }
  0x28   :  { %53 = vperm.xlu0 %2704, %v49_v1   ;;  %v73_v5 = vand.u32 4294901760, %v64_v2  ;;  %2410 = vmatprep.subr.bf16.mxu0 %v2785_v10  ;;  %v79_v14 = vand.u32 4294901760, %v66_v11  ;;  %v82_v15 = vand.u32 4294901760, %v67_v12  ;;  %v2788_v25 = vmov 0.0   ;;  %v2006_v41 = vld [vmem:[%s3621_s2] ss:$0 sm:$0xff] }
  0x29   :  { %1050 = vperm.xlu1 %2706, %v1045_v4   ;;  %v160_v9 = vsub.f32 %v65_v3, %v76_v6  ;;  %2446 = vmatprep.subr.bf16.mxu1 %v2785_v10  ;;  %v51_v39 = vand.u32 127, %v50_v38  ;;  %vm68_vm1 = vcmask 261120   ;;  %v2007_v47 = vld [vmem:[%s3622_s3] ss:$0 sm:$0xff]  ;;  %v2916_v3 = vld [vmem:[#allocation5 + $0x88] sm:$0xff]  ;;  %s2789_s2 = smov [#allocation7]  }
  0x2a   :  { %v2847_v7 = vpack.c.bf16 %v76_v6, %v73_v5  ;;  %v153_v8 = vsub.f32 %v64_v2, %v73_v5  ;;  %v2853_v18 = vpack.c.bf16 %v82_v15, %v79_v14  ;;  %v167_v21 = vsub.f32 %v66_v11, %v79_v14  ;;  %2286 = vmatprep.mubr.msk.f32.mxu0 %vm2787_vm0, %v2788_v25  ;;  %v2914_v2 = vld [vmem:[#allocation5 + $0x80] sm:$0xff]  ;;  %v2923_v5 = vld [vmem:[#allocation5 + $0x8] sm:$0xff]  ;;  %v2925_v6 = vld [vmem:[#allocation5 + $0x90] sm:$0xff]  ;;  %s1988_s3 = sshll.u32 %s2789_s2, 4  ;;  %s1989_s3 = int_to_ptr.vmem [resolvable:$true] %s1988_s3 }
  0x2b   :  { %v161_v17 = vand.u32 4294901760, %v160_v9  ;;  %v174_v22 = vsub.f32 %v67_v12, %v82_v15  ;;  %2352 = vmatprep.mubr.msk.f32.mxu1 %vm2787_vm0, %v2788_v25  ;;  %v2934_v12 = vld [vmem:[#allocation5 + $0x98] sm:$0xff]  ;;  %v1123_v14 = vand.u32 4294901760, %v2923_v5  ;;  %v1174_v15 = vand.u32 4294901760, %v2925_v6  ;;  %s2752_s22 = scalar_lea.vmem %s1989_s3, 128  ;;  %p2757_p3 = scmp.lt.s32.totalorder %s1989_s3, %s1989_s3 }
  0x2c   :  { %2705 = vset.pattern.permute.xlu0 %v2786_v13  ;;  %2412 = vmatpush3.bf16.msra.mxu0 %v2847_v7  ;;  %v154_v16 = vand.u32 4294901760, %v153_v8  ;;  %v168_v26 = vand.u32 4294901760, %v167_v21  ;;  %v2423_v34 = vpack.c.bf16 %v160_v9, %v153_v8  ;;  %p2753_p2 = scmp.ne.s32.totalorder %s1989_s3, %s2752_s22  ;;  %p2758_p4 = scmp.lt.s32.totalorder %s2752_s22, %s2752_s22 }
  0x2d   :  { %59 = vperm.xlu0 %2705, %v49_v1   ;;  %2413 = vmatprep.subr.bf16.mxu0 %v2785_v10  ;;  %v162_v20 = vsub.f32 %v160_v9, %v161_v17  ;;  %v175_v27 = vand.u32 4294901760, %v174_v22  ;;  %v2865_v35 = vpack.c.bf16 %v174_v22, %v167_v21  ;;  %v1171_v9 = vand.u32 4294901760, %v2916_v3 }
  0x2e   :  { %2707 = vset.pattern.permute.xlu1 %v2786_v13  ;;  %2448 = vmatpush3.bf16.msra.mxu1 %v2847_v7  ;;  %v155_v19 = vsub.f32 %v153_v8, %v154_v16  ;;  %v169_v29 = vsub.f32 %v167_v21, %v168_v26  ;;  %v2867_v36 = vpack.c.bf16 %v161_v17, %v154_v16  ;;  %v1168_v8 = vand.u32 4294901760, %v2914_v2  ;;  %v2936_v13 = vld [vmem:[#allocation5 + $0x10] sm:$0xff]  ;;  %v2944_v16 = vld [vmem:[#allocation5 + $0x18] sm:$0xff]  ;;  %p2759_p5 = por %p2758_p4, %p2757_p3 }
  0x2f   :  { %1072 = vperm.xlu1 %2707, %v1045_v4   ;;  %2449 = vmatprep.subr.bf16.mxu1 %v2785_v10  ;;  %v163_v24 = vand.u32 4294901760, %v162_v20  ;;  %v176_v30 = vsub.f32 %v174_v22, %v175_v27  ;;  %v2869_v37 = vpack.c.bf16 %v175_v27, %v168_v26  ;;  %v2918_v4 = vld [vmem:[#allocation5] sm:$0xff]  ;;  %v1126_v20 = vand.u32 4294901760, %v2936_v13 }
  0x30   :  { %2415 = vmatpush3.bf16.msra.mxu0 %v2853_v18  ;;  %v156_v23 = vand.u32 4294901760, %v155_v19  ;;  %v170_v31 = vand.u32 4294901760, %v169_v29  ;;  %v1120_v11 = vand.u32 4294901760, %v2918_v4  ;;  %v2951_v17 = vsub.f32 %v2914_v2, %v1168_v8  ;;  %p2760_p6 = pnand %p2759_p5, %p2753_p2 }
  0x31   :  { %2416 = vmatprep.subr.bf16.mxu0 %v2785_v10  ;;  %v177_v32 = vand.u32 4294901760, %v176_v30  ;;  %v1177_v19 = vand.u32 4294901760, %v2934_v12  ;;  %v2959_v21 = vsub.f32 %v2916_v3, %v1171_v9  ;;  %v1129_v26 = vand.u32 4294901760, %v2944_v16  ;;  %v2992_v30 = vld [vmem:[#allocation5 + $0xa0] sm:$0xff] }
  0x32   :  { %v2417_v28 = vpack.c.bf16 %v163_v24, %v156_v23  ;;  %2451 = vmatpush3.bf16.msra.mxu1 %v2853_v18  ;;  %v2964_v22 = vsub.f32 %v2918_v4, %v1120_v11  ;;  %v2969_v23 = vsub.f32 %v2923_v5, %v1123_v14  ;;  %v2974_v24 = vsub.f32 %v2925_v6, %v1174_v15 }
  0x33   :  { %2452 = vmatprep.subr.bf16.mxu1 %v2785_v10  ;;  %v2420_v33 = vpack.c.bf16 %v177_v32, %v170_v31  ;;  %v3632_v27 = vand.u32 4294901760, %v2951_v17  ;;  %v2990_v29 = vsub.f32 %v2936_v13, %v1126_v20  ;;  %v2994_v31 = vld [vmem:[#allocation5 + $0xa8] sm:$0xff]  ;;  %v3631_v32 = vand.u32 4294901760, %v2959_v21 }
  0x34   :  { %v3008_v38 = vsub.f32 %v2944_v16, %v1129_v26  ;;  %v3691_v16 = vand.u32 4294901760, %v2992_v30 }
  0xa7   :  { %v54_v40 = vpop.permute.xlu0 %53 }
  0xa8   :  { %vm55_vm2 = vcmp.eq.s32.totalorder %v51_v39, %v54_v40  ;;  %v1051_v43 = vpop.permute.xlu1 %1050  ;;  %v3634_v40 = vand.u32 4294901760, %v2994_v31 }
  0xa9   :  { %v2875_v42 = vsel %vm55_vm2, 1.0, %v2788_v25  ;;  %v1059_v45 = vmul.f32 %v2006_v41, %v1051_v43  ;;  %v1347_v43 = vsub.f32 %v2951_v17, %v3632_v27 }
  0xaa   :  { %v70_v44 = vsel %vm68_vm1, %v2875_v42, 0 }
  0xab   :  { %v2879_v46 = vsub.f32 %v70_v44, %v70_v44  ;;  %v1060_v49 = vmax.f32 %v1059_v45, 0.0  ;;  %v3625_v45 = vand.u32 4294901760, %v2990_v29 }
  0xac   :  { %v60_v48 = vpop.permute.xlu0 %59 }
  0xad   :  { %vm61_vm3 = vcmp.eq.s32.totalorder %v51_v39, %v60_v48  ;;  %v143_v50 = vand.u32 4294901760, %v2879_v46  ;;  %v1067_v53 = vmul.f32 %v2007_v47, %v1060_v49  ;;  %v3637_v39 = vand.u32 4294901760, %v2992_v30 }
  0xae   :  { %v2886_v51 = vsel %vm61_vm3, 1.0, %v2788_v25  ;;  %v1073_v52 = vpop.permute.xlu1 %1072 }
  0xaf   :  { %v558_v54 = vsel %vm68_vm1, %v2886_v51, 0  ;;  %v144_v55 = vsub.f32 %v2879_v46, %v143_v50  ;;  %v1075_v56 = vmul.f32 %v2006_v41, %v1073_v52  ;;  %v1068_v58 = vsel %vm68_vm1, %v1067_v53, 0.0  ;;  %v3015_v41 = vld [vmem:[#allocation5 + $0x20] sm:$0xff] }
  0xb0   :  { %v2893_v57 = vsub.f32 %v558_v54, %v558_v54  ;;  %1069 = vadd.xlane.f32.xlu1 %v1068_v58  ;;  %v3629_v52 = vand.u32 4294901760, %v3008_v38  ;;  %v3633_v53 = vand.u32 4294901760, %v3015_v41  ;;  %v3043_v54 = vld [vmem:[#allocation5 + $0xb0] sm:$0xff]  ;;  %v3058_v58 = vsub.f32 %v2994_v31, %v3634_v40 }
  0xb1   :  { %v145_v59 = vand.u32 4294901760, %v144_v55  ;;  %v1076_v60 = vmax.f32 %v1075_v56, 0.0  ;;  %v3045_v55 = vld [vmem:[#allocation5 + $0xb8] sm:$0xff]  ;;  %v3053_v56 = vsub.f32 %v2992_v30, %v3637_v39 }
  0xb2   :  { %v631_v61 = vand.u32 4294901760, %v2893_v57 }
  0xb3   :  { %2287 = vmatmul.mubr.f32.vlgmr.msra.gmra.mrb[0].mxu0 %v145_v59  ;;  %v1077_v62 = vmul.f32 %v2007_v47, %v1076_v60  ;;  %v1354_v47 = vsub.f32 %v2959_v21, %v3631_v32  ;;  %v1348_v60 = vand.u32 4294901760, %v1347_v43  ;;  %v3078_v43 = vld [vmem:[#allocation5 + $0x38] sm:$0xff] }
  0xb4   :  { %2418 = vmatpush3.bf16.msra.mxu0 %v2417_v28  ;;  %v632_v63 = vsub.f32 %v2893_v57, %v631_v61  ;;  %2297 = vmatprep.mubr.msk.f32.mxu0 %vm2787_vm0, %v2788_v25  ;;  %v3664_v40 = vand.u32 4294901760, %v3078_v43 }
  0xb5   :  { %2419 = vmatprep.subr.bf16.mxu0 %v2785_v10  ;;  %v1078_v0 = vsel %vm68_vm1, %v1077_v62, 0.0  ;;  %v3071_v62 = vld [vmem:[#allocation5 + $0x30] sm:$0xff] }
  0xb6   :  { %v633_v1 = vand.u32 4294901760, %v632_v63  ;;  %1079 = vadd.xlane.f32.xlu0 %v1078_v0  ;;  %v3636_v0 = vand.u32 4294901760, %v3043_v54 }
  0xb8   :  { %2421 = vmatpush3.bf16.msra.mxu0 %v2420_v33  ;;  %2353 = vmatmul.mubr.f32.vlgmr.msra.gmra.mrb[0].mxu1 %v633_v1  ;;  %v3638_v1 = vand.u32 4294901760, %v3045_v55 }
  0xb9   :  { %2454 = vmatpush3.bf16.msra.mxu1 %v2417_v28  ;;  %2422 = vmatprep.subr.bf16.mxu0 %v2785_v10  ;;  %v2985_v28 = vsub.f32 %v2934_v12, %v1177_v19 }
  0xba   :  { %2455 = vmatprep.subr.bf16.mxu1 %v2785_v10  ;;  %2363 = vmatprep.mubr.msk.f32.mxu1 %vm2787_vm0, %v2788_v25 }
  0xbb   :  { %2298 = vmatmul.mubr.msk.f32.vlgmr.msra.gmra.mrb[0].mxu0 %vm68_vm1, %v2875_v42  ;;  %v3626_v44 = vand.u32 4294901760, %v2985_v28 }
  0xbc   :  { %2424 = vmatpush3.bf16.msra.mxu0 %v2423_v34  ;;  %2308 = vmatprep.mubr.msk.f32.mxu0 %vm2787_vm0, %v2788_v25 }
  0xbd   :  { %2457 = vmatpush3.bf16.msra.mxu1 %v2420_v33  ;;  %2425 = vmatprep.subr.bf16.mxu0 %v2785_v10  ;;  %v3630_v33 = vand.u32 4294901760, %v2964_v22 }
  0xbe   :  { %2458 = vmatprep.subr.bf16.mxu1 %v2785_v10 }
  0xbf   :  { %v1235_v48 = vsub.f32 %v2964_v22, %v3630_v33  ;;  %v3666_v33 = vand.u32 4294901760, %v3071_v62 }
  0xc0   :  { %2427 = vmatpush3.bf16.msra.mxu0 %v2865_v35  ;;  %2364 = vmatmul.mubr.msk.f32.vlgmr.msra.gmra.mrb[0].mxu1 %vm68_vm1, %v2886_v51 }
  0xc1   :  { %2460 = vmatpush3.bf16.msra.mxu1 %v2423_v34  ;;  %2428 = vmatprep.subr.bf16.mxu0 %v2785_v10  ;;  %v3628_v34 = vand.u32 4294901760, %v2969_v23  ;;  %v1236_v63 = vand.u32 4294901760, %v1235_v48  ;;  %v3093_v48 = vld [vmem:[#allocation5 + $0xc0] sm:$0xff]  ;;  %v3155_v5 = vsub.f32 %v3071_v62, %v3666_v33  ;;  %v3699_v33 = vand.u32 4294901760, %v3071_v62 }
  0xc2   :  { %2461 = vmatprep.subr.bf16.mxu1 %v2785_v10  ;;  %2374 = vmatprep.mubr.msk.f32.mxu1 %vm2787_vm0, %v2788_v25  ;;  %v3663_v2 = vand.u32 4294901760, %v3093_v48 }
  0xc3   :  { %2309 = vmatmul.mubr.f32.vlgmr.msra.gmra.mrb[0].mxu0 %v2879_v46  ;;  %v3024_v46 = vld [vmem:[#allocation5 + $0x28] sm:$0xff]  ;;  %v1242_v49 = vsub.f32 %v2969_v23, %v3628_v34  ;;  %3687 = vst [vmem:[#allocation11_spill] sm:$0xff] %v3155_v5 }
  0xc4   :  { %2430 = vmatpush3.bf16.msra.mxu0 %v2847_v7  ;;  %2319 = vmatprep.mubr.msk.f32.mxu0 %vm2787_vm0, %v2788_v25  ;;  %v3635_v59 = vand.u32 4294901760, %v3024_v46  ;;  %v3095_v34 = vld [vmem:[#allocation5 + $0xc8] sm:$0xff]  ;;  %v3180_v6 = vsub.f32 %v3093_v48, %v3663_v2 }
  0xc5   :  { %2463 = vmatpush3.bf16.msra.mxu1 %v2865_v35  ;;  %2431 = vmatprep.subr.bf16.mxu0 %v2785_v10  ;;  %v3627_v35 = vand.u32 4294901760, %v2974_v24  ;;  %v3661_v3 = vand.u32 4294901760, %v3095_v34 }
  0xc6   :  { %2464 = vmatprep.subr.bf16.mxu1 %v2785_v10  ;;  %3689 = vst [vmem:[#allocation13_spill] sm:$0xff] %v3180_v6 }
  0xc7   :  { %v3185_v12 = vsub.f32 %v3095_v34, %v3661_v3 }
  0xc8   :  { %2433 = vmatpush3.bf16.msra.mxu0 %v2853_v18  ;;  %2375 = vmatmul.mubr.f32.vlgmr.msra.gmra.mrb[0].mxu1 %v2893_v57  ;;  %v1368_v57 = vsub.f32 %v2985_v28, %v3626_v44 }
  0xc9   :  { %2466 = vmatpush3.bf16.msra.mxu1 %v2847_v7  ;;  %2434 = vmatprep.subr.bf16.mxu0 %v2785_v10  ;;  %3690 = vst [vmem:[#allocation14_spill] sm:$0xff] %v3185_v12 }
  0xca   :  { %2467 = vmatprep.subr.bf16.mxu1 %v2785_v10  ;;  %2385 = vmatprep.mubr.msk.f32.mxu1 %vm2787_vm0, %v2788_v25  ;;  %v1369_v32 = vand.u32 4294901760, %v1368_v57 }
  0xcb   :  { %2320 = vmatmul.mubr.f32.vlgmr.msra.gmra.mrb[0].mxu0 %v143_v50  ;;  %v3039_v50 = vsub.f32 %v2974_v24, %v3627_v35  ;;  %v3086_v35 = vsub.f32 %v3008_v38, %v3629_v52  ;;  %v3105_v52 = vsub.f32 %v3024_v46, %v3635_v59  ;;  %v3122_v59 = vsub.f32 %v3043_v54, %v3636_v0 }
  0xcc   :  { %2436 = vmatpush3.bf16.msra.mxu0 %v2867_v36  ;;  %2330 = vmatprep.mubr.msk.f32.mxu0 %vm2787_vm0, %v2788_v25  ;;  %v3139_v0 = vpack.c.bf16 %v1123_v14, %v1120_v11  ;;  %v3164_v11 = vpack.c.bf16 %v1177_v19, %v1174_v15  ;;  %v3169_v14 = vsub.f32 %v3078_v43, %v3664_v40 }
  0xcd   :  { %2469 = vmatpush3.bf16.msra.mxu1 %v2853_v18  ;;  %2437 = vmatprep.subr.bf16.mxu0 %v2785_v10  ;;  %v1362_v44 = vand.u32 4294901760, %v3039_v50  ;;  %v3639_v50 = vand.u32 4294901760, %v3058_v58  ;;  %v3643_v4 = vand.u32 4294901760, %v3105_v52  ;;  %v1257_v15 = vand.u32 4294901760, %v3086_v35 }
  0xce   :  { %2470 = vmatprep.subr.bf16.mxu1 %v2785_v10  ;;  %3688 = vst [vmem:[#allocation12_spill] sm:$0xff] %v3169_v14  ;;  %v3649_v13 = vand.u32 4294901760, %v3169_v14 }
  0xd0   :  { %2439 = vmatpush3.bf16.msra.mxu0 %v2869_v37  ;;  %2386 = vmatmul.mubr.f32.vlgmr.msra.gmra.mrb[0].mxu1 %v631_v61  ;;  %v3069_v61 = vsub.f32 %v2990_v29, %v3625_v45  ;;  %v1243_v45 = vand.u32 4294901760, %v1242_v49  ;;  %v3640_v49 = vand.u32 4294901760, %v3053_v56 }
  0xd1   :  { %2472 = vmatpush3.bf16.msra.mxu1 %v2867_v36  ;;  %2440 = vmatprep.subr.bf16.mxu0 %v2785_v10  ;;  %v1355_v36 = vand.u32 4294901760, %v1354_v47  ;;  %v3091_v47 = vsub.f32 %v3015_v41, %v3633_v53  ;;  %v3115_v53 = vpack.c.bf16 %v1171_v9, %v1168_v8  ;;  %v3131_v8 = vld [vmem:[#allocation5 + $0x40] sm:$0xff]  ;;  %v3133_v9 = vld [vmem:[#allocation5 + $0x48] sm:$0xff] }
  0xd2   :  { %2473 = vmatprep.subr.bf16.mxu1 %v2785_v10  ;;  %2396 = vmatprep.mubr.msk.f32.mxu1 %vm2787_vm0, %v2788_v25  ;;  %v1250_v27 = vand.u32 4294901760, %v3069_v61  ;;  %v2516_v61 = vpack.c.bf16 %v1243_v45, %v1236_v63  ;;  %v1382_v45 = vsub.f32 %v3058_v58, %v3639_v50  ;;  %v3197_v63 = vpack.c.bf16 %v1129_v26, %v1126_v20 }
  0xd3   :  { %2331 = vmatmul.mubr.msk.f32.vlgmr.msra.gmra.mrb[0].mxu0 %vm68_vm1, %v2875_v42  ;;  %v2514_v57 = vpack.c.bf16 %v1355_v36, %v1348_v60  ;;  %v3644_v39 = vand.u32 4294901760, %v3091_v47  ;;  %v3660_v60 = vand.u32 4294901760, %v3131_v8  ;;  %v3655_v36 = vand.u32 4294901760, %v3133_v9 }
  0xd4   :  { %2442 = vmatpush3.bf16.msra.mxu0 %v2847_v7  ;;  %2341 = vmatprep.mubr.msk.f32.mxu0 %vm2787_vm0, %v2788_v25  ;;  %v3692_v20 = vand.u32 4294901760, %v2994_v31  ;;  %v3648_v31 = vand.u32 4294901760, %v3180_v6 }
  0xd5   :  { %2475 = vmatpush3.bf16.msra.mxu1 %v2869_v37  ;;  %2443 = vmatprep.subr.bf16.mxu0 %v2785_v10  ;;  %v3127_v37 = vsub.f32 %v3045_v55, %v3638_v1  ;;  %v1375_v1 = vsub.f32 %v3053_v56, %v3640_v49  ;;  %v1263_v19 = vsub.f32 %v3091_v47, %v3644_v39  ;;  %v1383_v49 = vand.u32 4294901760, %v1382_v45 }
  0xd6   :  { %2476 = vmatprep.subr.bf16.mxu1 %v2785_v10  ;;  %v3211_v26 = vpack.c.bf16 %v3692_v20, %v3691_v16  ;;  %v3216_v35 = vsub.f32 %v3131_v8, %v3660_v60  ;;  %v2520_v45 = vpack.c.bf16 %v1257_v15, %v1250_v27 }
  0xd7   :  { %v1376_v50 = vand.u32 4294901760, %v1375_v1  ;;  %v3645_v1 = vand.u32 4294901760, %v3185_v12  ;;  %v1264_v16 = vand.u32 4294901760, %v1263_v19 }
  0xd8   :  { %2445 = vmatpush3.bf16.msra.mxu0 %v2853_v18  ;;  %2397 = vmatmul.mubr.msk.f32.vlgmr.msra.gmra.mrb[0].mxu1 %vm68_vm1, %v2886_v51  ;;  %3693 = vst [vmem:[#allocation15_spill] sm:$0xff] %v3216_v35  ;;  %v3646_v27 = vand.u32 4294901760, %v3216_v35 }
  0xd9   :  { %2478 = vmatpush3.bf16.msra.mxu1 %v2847_v7  ;;  %2407 = vmatprep.mubr.msk.f32.mxu1 %vm2787_vm0, %v2788_v25  ;;  %v3641_v7 = vand.u32 4294901760, %v3122_v59  ;;  %v3642_v25 = vand.u32 4294901760, %v3127_v37  ;;  %v2522_v39 = vpack.c.bf16 %v1383_v49, %v1376_v50 }
  0xda   :  { %2479 = vmatprep.subr.bf16.mxu1 %v2785_v10  ;;  %2483 = vmatprep.subr.bf16.mxu0 %v3115_v53  ;;  %v2518_v10 = vpack.c.bf16 %v1369_v32, %v1362_v44  ;;  %v3650_v32 = vand.u32 4294901760, %v3155_v5  ;;  %v3221_v44 = vsub.f32 %v3133_v9, %v3655_v36 }
  0xdb   :  { %2342 = vmatmul.mubr.msk.f32.vlgmr.msra.gmra.mrb[0].mxu0 %vm68_vm1, %v2875_v42  ;;  %v1270_v42 = vsub.f32 %v3105_v52, %v3643_v4  ;;  %v1396_v30 = vsub.f32 %v3127_v37, %v3642_v25  ;;  %v3696_v25 = vand.u32 4294901760, %v3024_v46  ;;  %v1410_v46 = vsub.f32 %v3185_v12, %v3645_v1 }
  0xdc   :  { %2485 = vmatpush3.bf16.msra.mxu0 %v3139_v0  ;;  %3694 = vst [vmem:[#allocation16_spill] sm:$0xff] %v3221_v44  ;;  %v3647_v15 = vand.u32 4294901760, %v3221_v44  ;;  %v3698_v12 = vand.u32 4294901760, %v3045_v55 }
  0xdd   :  { %2481 = vmatpush3.bf16.msra.mxu1 %v2853_v18  ;;  %2487 = vmatprep.subr.bf16.mxu0 %v3164_v11  ;;  %v1389_v18 = vsub.f32 %v3122_v59, %v3641_v7  ;;  %v1271_v20 = vand.u32 4294901760, %v1270_v42  ;;  %v3695_v7 = vand.u32 4294901760, %v3015_v41  ;;  %v1397_v42 = vand.u32 4294901760, %v1396_v30 }
  0xde   :  { %2515 = vmatprep.subr.bf16.mxu1 %v2514_v57  ;;  %v1277_v57 = vsub.f32 %v3155_v5, %v3650_v32  ;;  %v1403_v41 = vsub.f32 %v3180_v6, %v3648_v31  ;;  %v1411_v30 = vand.u32 4294901760, %v1410_v46 }
  0xdf   :  { %v3241_v4 = vpack.c.bf16 %v3696_v25, %v3695_v7  ;;  %v1390_v19 = vand.u32 4294901760, %v1389_v18  ;;  %v2524_v49 = vpack.c.bf16 %v1271_v20, %v1264_v16  ;;  %v1291_v7 = vsub.f32 %v3216_v35, %v3646_v27  ;;  %v3264_v27 = vld [vmem:[#allocation5 + $0xd8] sm:$0xff] }
  0xe0   :  { %2408 = vmatmul.mubr.msk.f32.vlgmr.msra.gmra.mrb[0].mxu1 %vm68_vm1, %v2886_v51  ;;  %2489 = vmatpush3.bf16.msra.mxu0 %v3197_v63  ;;  %v1284_v51 = vsub.f32 %v3169_v14, %v3649_v13  ;;  %v1278_v50 = vand.u32 4294901760, %v1277_v57  ;;  %v1298_v25 = vsub.f32 %v3221_v44, %v3647_v15  ;;  %v1404_v18 = vand.u32 4294901760, %v1403_v41  ;;  %v1117_v44 = vld [vmem:[#allocation5 + $0xf0] sm:$0xff] }
  0xe1   :  { %2517 = vmatpush3.bf16.msra.mxu1 %v2516_v61  ;;  %2491 = vmatprep.subr.bf16.mxu0 %v3211_v26  ;;  %v1292_v16 = vand.u32 4294901760, %v1291_v7  ;;  %v3294_v7 = vld [vmem:[#allocation5 + $0xe0] sm:$0xff]  ;;  %v3697_v35 = vand.u32 4294901760, %v3043_v54  ;;  %v1210_v62 = vand.u32 4294901760, %v1117_v44 }
  0xe2   :  { %2519 = vmatprep.subr.bf16.mxu1 %v2518_v10  ;;  %v1285_v61 = vand.u32 4294901760, %v1284_v51  ;;  %v2526_v10 = vpack.c.bf16 %v1397_v42, %v1390_v19  ;;  %v1299_v20 = vand.u32 4294901760, %v1298_v25  ;;  %v3262_v51 = vld [vmem:[#allocation5 + $0xd0] sm:$0xff]  ;;  %v3270_v42 = vld [vmem:[#allocation5 + $0x58] sm:$0xff]  ;;  %v3296_v25 = vld [vmem:[#allocation5 + $0xe8] sm:$0xff] }
  0xe3   :  { %v3654_v15 = vand.u32 4294901760, %v3262_v51  ;;  %v3268_v19 = vld [vmem:[#allocation5 + $0x50] sm:$0xff]  ;;  %v3651_v46 = vand.u32 4294901760, %v3270_v42  ;;  %v3378_v5 = vsub.f32 %v1117_v44, %v1210_v62 }
  0xe4   :  { %2493 = vmatpush3.bf16.msra.mxu0 %v3241_v4  ;;  %v2528_v1 = vpack.c.bf16 %v1285_v61, %v1278_v50  ;;  %v2532_v57 = vpack.c.bf16 %v1299_v20, %v1292_v16  ;;  %v3652_v41 = vand.u32 4294901760, %v3268_v19  ;;  %v3659_v16 = vand.u32 4294901760, %v3296_v25  ;;  %v3302_v20 = vld [vmem:[#allocation5 + $0x60] sm:$0xff] }
  0xe5   :  { %2521 = vmatpush3.bf16.msra.mxu1 %v2520_v45  ;;  %v2530_v45 = vpack.c.bf16 %v1411_v30, %v1404_v18  ;;  %v3292_v61 = vsub.f32 %v3270_v42, %v3651_v46  ;;  %v3658_v30 = vand.u32 4294901760, %v3294_v7  ;;  %v3669_v13 = vand.u32 4294901760, %v3302_v20 }
  0xe6   :  { %2523 = vmatprep.subr.bf16.mxu1 %v2522_v39  ;;  %v3653_v39 = vand.u32 4294901760, %v3264_v27  ;;  %v3287_v50 = vsub.f32 %v3268_v19, %v3652_v41 }
  0xe7   :  { %v3665_v31 = vand.u32 4294901760, %v3292_v61 }
  0xe9   :  { %2525 = vmatpush3.bf16.msra.mxu1 %v2524_v49  ;;  %v3282_v49 = vsub.f32 %v3264_v27, %v3653_v39  ;;  %v3319_v39 = vsub.f32 %v3294_v7, %v3658_v30 }
  0xea   :  { %2527 = vmatprep.subr.bf16.mxu1 %v2526_v10 }
  0xeb   :  { %v3657_v18 = vand.u32 4294901760, %v3282_v49  ;;  %v3678_v3 = vand.u32 4294901760, %v3319_v39 }
  0xed   :  { %2529 = vmatpush3.bf16.msra.mxu1 %v2528_v1  ;;  %v3277_v1 = vsub.f32 %v3262_v51, %v3654_v15  ;;  %v1424_v41 = vsub.f32 %v3282_v49, %v3657_v18  ;;  %v3324_v15 = vsub.f32 %v3296_v25, %v3659_v16  ;;  %v3335_v18 = vsub.f32 %v3302_v20, %v3669_v13  ;;  %v1118_v13 = vld [vmem:[#allocation5 + $0xf8] sm:$0xff] }
  0xee   :  { %2531 = vmatprep.subr.bf16.mxu1 %v2530_v45  ;;  %v3304_v45 = vld [vmem:[#allocation5 + $0x68] sm:$0xff]  ;;  %v1213_v14 = vand.u32 4294901760, %v1118_v13 }
  0xef   :  { %v3656_v10 = vand.u32 4294901760, %v3277_v1  ;;  %v3674_v32 = vand.u32 4294901760, %v3304_v45  ;;  %v1425_v60 = vand.u32 4294901760, %v1424_v41  ;;  %v1431_v41 = vsub.f32 %v3319_v39, %v3678_v3 }
  0xf0   :  { %v3701_v55 = vand.u32 4294901760, %v3335_v18 }
  0xf1   :  { %2533 = vmatpush3.bf16.msra.mxu1 %v2532_v57  ;;  %v3662_v57 = vand.u32 4294901760, %v3287_v50  ;;  %v1417_v46 = vsub.f32 %v3277_v1, %v3656_v10  ;;  %v1312_v10 = vsub.f32 %v3292_v61, %v3665_v31  ;;  %v3340_v30 = vsub.f32 %v3304_v45, %v3674_v32 }
  0xf2   :  { %v3350_v32 = vpack.c.bf16 %v3698_v12, %v3697_v35  ;;  %v3700_v31 = vand.u32 4294901760, %v3078_v43 }
  0xf3   :  { %v1305_v36 = vsub.f32 %v3287_v50, %v3662_v57  ;;  %v1418_v16 = vand.u32 4294901760, %v1417_v46  ;;  %v3677_v57 = vand.u32 4294901760, %v3324_v15  ;;  %v1313_v40 = vand.u32 4294901760, %v1312_v10  ;;  %v1101_v10 = vld [vmem:[#allocation5 + $0x70] sm:$0xff] }
  0xf4   :  { %v3362_v6 = vpack.c.bf16 %v3700_v31, %v3699_v33  ;;  %v3702_v12 = vand.u32 4294901760, %v3340_v30  ;;  %2495 = vmatprep.subr.bf16.mxu0 %v3350_v32  ;;  %v3703_v33 = vand.u32 4294901760, %v3093_v48 }
  0xf5   :  { %v1306_v2 = vand.u32 4294901760, %v1305_v36  ;;  %v2534_v46 = vpack.c.bf16 %v1425_v60, %v1418_v16  ;;  %v1438_v36 = vsub.f32 %v3324_v15, %v3677_v57  ;;  %v1319_v60 = vsub.f32 %v3335_v18, %v3701_v55  ;;  %v1102_v16 = vld [vmem:[#allocation5 + $0x78] sm:$0xff] }
  0xf6   :  { %v1326_v35 = vsub.f32 %v3340_v30, %v3702_v12  ;;  %v1432_v57 = vand.u32 4294901760, %v1431_v41  ;;  %2497 = vmatpush3.bf16.msra.mxu0 %v3362_v6  ;;  %v1162_v55 = vand.u32 4294901760, %v1101_v10  ;;  %v1165_v41 = vand.u32 4294901760, %v1102_v16 }
  0xf7   :  { %v2536_v54 = vpack.c.bf16 %v1313_v40, %v1306_v2  ;;  %2535 = vmatprep.subr.bf16.mxu1 %v2534_v46  ;;  %v1439_v3 = vand.u32 4294901760, %v1438_v36  ;;  %v3704_v40 = vand.u32 4294901760, %v3095_v34  ;;  %v1320_v2 = vand.u32 4294901760, %v1319_v60 }
  0xf8   :  { %v1327_v31 = vand.u32 4294901760, %v1326_v35  ;;  %v3380_v46 = vsub.f32 %v1118_v13, %v1213_v14  ;;  %v3705_v36 = vand.u32 4294901760, %v3131_v8  ;;  %v3686_v60 = vand.u32 4294901760, %v3378_v5 }
  0xf9   :  { %2537 = vmatpush3.bf16.msra.mxu1 %v2536_v54  ;;  %v3376_v43 = vpack.c.bf16 %v3704_v40, %v3703_v33  ;;  %v2538_v12 = vpack.c.bf16 %v1439_v3, %v1432_v57  ;;  %v3706_v54 = vand.u32 4294901760, %v3133_v9  ;;  %v3389_v33 = vsub.f32 %v1101_v10, %v1162_v55 }
  0xfa   :  { %v2540_v34 = vpack.c.bf16 %v1327_v31, %v1320_v2  ;;  %v3685_v3 = vand.u32 4294901760, %v3380_v46  ;;  %v3393_v44 = vsub.f32 %v1102_v16, %v1165_v41  ;;  %v3707_v8 = vand.u32 4294901760, %v3262_v51 }
  0xfb   :  { %2499 = vmatprep.subr.bf16.mxu0 %v3376_v43  ;;  %v3387_v48 = vpack.c.bf16 %v3706_v54, %v3705_v36  ;;  %2539 = vmatprep.subr.bf16.mxu1 %v2538_v12  ;;  %v3684_v13 = vand.u32 4294901760, %v3389_v33  ;;  %v3708_v9 = vand.u32 4294901760, %v3264_v27  ;;  %v1445_v10 = vsub.f32 %v3378_v5, %v3686_v60 }
  0xfc   :  { %v1452_v35 = vsub.f32 %v3380_v46, %v3685_v3  ;;  %v3683_v16 = vand.u32 4294901760, %v3393_v44  ;;  %v3709_v40 = vand.u32 4294901760, %v3268_v19  ;;  %v3710_v2 = vand.u32 4294901760, %v3270_v42 }
  0xfd   :  { %2501 = vmatpush3.bf16.msra.mxu0 %v3387_v48  ;;  %2541 = vmatpush3.bf16.msra.mxu1 %v2540_v34  ;;  %v3401_v57 = vpack.c.bf16 %v3708_v9, %v3707_v8  ;;  %v1333_v27 = vsub.f32 %v3389_v33, %v3684_v13  ;;  %v1446_v51 = vand.u32 4294901760, %v1445_v10  ;;  %v3711_v42 = vand.u32 4294901760, %v3294_v7 }
  0xfe   :  { %v3414_v31 = vpack.c.bf16 %v3710_v2, %v3709_v40  ;;  %v1453_v12 = vand.u32 4294901760, %v1452_v35  ;;  %v1340_v36 = vsub.f32 %v3393_v44, %v3683_v16  ;;  %v3712_v8 = vand.u32 4294901760, %v3296_v25 }
  0xff   :  { %2503 = vmatprep.subr.bf16.mxu0 %v3401_v57  ;;  %v1334_v54 = vand.u32 4294901760, %v1333_v27  ;;  %v3713_v40 = vand.u32 4294901760, %v3302_v20  ;;  %v3714_v10 = vand.u32 4294901760, %v3304_v45  ;;  %v3438_v27 = vpack.c.bf16 %v1213_v14, %v1210_v62 }
 0x100   :  { %v2542_v19 = vpack.c.bf16 %v1453_v12, %v1446_v51  ;;  %v1341_v34 = vand.u32 4294901760, %v1340_v36  ;;  %v3428_v9 = vpack.c.bf16 %v3712_v8, %v3711_v42  ;;  %v3442_v7 = vpack.c.bf16 %v1165_v41, %v1162_v55 }
 0x101   :  { %2505 = vmatpush3.bf16.msra.mxu0 %v3414_v31  ;;  %v3434_v35 = vpack.c.bf16 %v3714_v10, %v3713_v40  ;;  %v2546_v25 = vpack.c.bf16 %v2959_v21, %v2951_v17  ;;  %v2566_v20 = vpack.c.bf16 %v3282_v49, %v3277_v1  ;;  %v2568_v45 = vpack.c.bf16 %v3292_v61, %v3287_v50 }
 0x102   :  { %2543 = vmatprep.subr.bf16.mxu1 %v2542_v19  ;;  %v2544_v2 = vpack.c.bf16 %v1341_v34, %v1334_v54  ;;  %2507 = vmatprep.subr.bf16.mxu0 %v3428_v9  ;;  %v2570_v14 = vpack.c.bf16 %v3324_v15, %v3319_v39  ;;  %v2572_v62 = vpack.c.bf16 %v3340_v30, %v3335_v18 }
 0x103   :  { %v2574_v55 = vpack.c.bf16 %v3380_v46, %v3378_v5  ;;  %v2576_v41 = vpack.c.bf16 %v3393_v44, %v3389_v33 }
 0x104   :  { %2545 = vmatpush3.bf16.msra.mxu1 %v2544_v2 }
 0x105   :  { %2509 = vmatpush3.bf16.msra.mxu0 %v3434_v35  ;;  %2579 = vmatprep.subr.bf16.mxu1 %v3115_v53 }
 0x106   :  { %2511 = vmatprep.subr.bf16.mxu0 %v3438_v27 }
 0x109   :  { %2513 = vmatpush3.bf16.msra.mxu0 %v3442_v7 }
 0x10a   :  { %2547 = vmatprep.subr.bf16.mxu0 %v2546_v25 }
 0x13d   :  { %v1070_v54 = vpop.xlane.xlu1 %1069 }
 0x143   :  { %v1080_v36 = vpop.xlane.xlu0 %1079 }
 0x144   :  { %v1082_v42 = vmul.f32 %v1080_v36, %v1070_v54 }
 0x1ae   :  { %v553_v51 = vpop.f32.mrb[0].mxu0 }
 0x1af   :  { %v2343_v12 = vpop.f32.mrb[1].mxu0  ;;  %v1085_v34 = vmul.f32 %v1080_v36, %v553_v51 }
 0x1b3   :  { %v1041_v19 = vpop.f32.mrb[0].mxu1 }
 0x1b4   :  { %v1081_v8 = vmul.f32 %v1041_v19, %v553_v51  ;;  %v1084_v40 = vmul.f32 %v1070_v54, %v1041_v19  ;;  %v2409_v10 = vpop.f32.mrb[1].mxu1 }
 0x1b5   :  { %v2554_v10 = vpack.c.bf16 %v3058_v58, %v3053_v56 }
 0x1b6   :  { %v1083_v2 = vsub.f32 %v1081_v8, %v1082_v42  ;;  %v1086_v25 = vadd.f32 %v1085_v34, %v1084_v40  ;;  %v2548_v42 = vpack.c.bf16 %v2969_v23, %v2964_v22  ;;  %v2550_v8 = vpack.c.bf16 %v2985_v28, %v2974_v24 }
 0x1b7   :  { %v2552_v40 = vpack.c.bf16 %v3008_v38, %v2990_v29 }
 0x1b8   :  { %v3459_v16 = vand.u32 4294901760, %v1086_v25  ;;  %v3461_v13 = vand.u32 4294901760, %v1083_v2 }
 0x1ba   :  { %v1216_v3 = vsub.f32 %v1086_v25, %v3459_v16  ;;  %v3465_v60 = vsub.f32 %v1083_v2, %v3461_v13  ;;  %1456 = vmatprep.mubr.f32.mxu1 %v3459_v16  ;;  %v2556_v2 = vpack.c.bf16 %v3105_v52, %v3091_v47  ;;  %v2558_v25 = vpack.c.bf16 %v3127_v37, %v3122_v59 }
 0x1bb   :  { %1458 = vmatmul.mubr.f32.vlgmr.msra.gmra.mrb[2].mxu1 %v3461_v13 }
 0x1bc   :  { %2581 = vmatpush3.bf16.msra.mxu1 %v3139_v0  ;;  %v1217_v51 = vand.u32 4294901760, %v1216_v3  ;;  %v1223_v12 = vand.u32 4294901760, %v3465_v60 }
 0x1bd   :  { %2583 = vmatprep.subr.bf16.mxu1 %v3164_v11 }
 0x1be   :  { %1700 = vmatprep.mubr.f32.mxu1 %v1217_v51  ;;  %v1218_v36 = vsub.f32 %v1216_v3, %v1217_v51  ;;  %v1224_v54 = vsub.f32 %v3465_v60, %v1223_v12  ;;  %v3716_v51 = vld [vmem:[#allocation12_spill] sm:$0xff] }
 0x1c0   :  { %2585 = vmatpush3.bf16.msra.mxu1 %v3197_v63  ;;  %v1219_v19 = vand.u32 4294901760, %v1218_v36  ;;  %v1225_v34 = vand.u32 4294901760, %v1224_v54  ;;  %v3717_v54 = vld [vmem:[#allocation13_spill] sm:$0xff] }
 0x1c1   :  { %2587 = vmatprep.subr.bf16.mxu1 %v3211_v26 }
 0x1c2   :  { %1220 = vmatprep.mubr.f32.mxu0 %v1219_v19  ;;  %v3718_v19 = vld [vmem:[#allocation14_spill] sm:$0xff] }
 0x1c3   :  { %1226 = vmatmul.mubr.f32.vlgmr.msra.gmra.mrb[2].mxu0 %v1225_v34  ;;  %v2562_v34 = vpack.c.bf16 %v3718_v19, %v3717_v54 }
 0x1c4   :  { %2549 = vmatpush3.bf16.msra.mxu0 %v2548_v42  ;;  %2589 = vmatpush3.bf16.msra.mxu1 %v3241_v4  ;;  %v3719_v42 = vld [vmem:[#allocation15_spill] sm:$0xff] }
 0x1c5   :  { %1593 = vmatprep.mubr.f32.mxu0 %v1216_v3  ;;  %2551 = vmatprep.subr.bf16.mxu0 %v2550_v8  ;;  %v3715_v3 = vld [vmem:[#allocation11_spill] sm:$0xff]  ;;  %v3720_v8 = vld [vmem:[#allocation16_spill] sm:$0xff] }
 0x1c6   :  { %2591 = vmatprep.subr.bf16.mxu1 %v3350_v32  ;;  %v2560_v36 = vpack.c.bf16 %v3716_v51, %v3715_v3 }
 0x1c8   :  { %2553 = vmatpush3.bf16.msra.mxu0 %v2552_v40  ;;  %2593 = vmatpush3.bf16.msra.mxu1 %v3362_v6  ;;  %v2564_v40 = vpack.c.bf16 %v3720_v8, %v3719_v42 }
 0x1c9   :  { %2555 = vmatprep.subr.bf16.mxu0 %v2554_v10  ;;  %2595 = vmatprep.subr.bf16.mxu1 %v3376_v43  ;;  %v3743_v10 = vand.u32 4294901760, %v3287_v50  ;;  %v3749_v50 = vand.u32 4294901760, %v3378_v5 }
 0x1cc   :  { %2557 = vmatpush3.bf16.msra.mxu0 %v2556_v2  ;;  %2597 = vmatpush3.bf16.msra.mxu1 %v3387_v48 }
 0x1cd   :  { %2559 = vmatprep.subr.bf16.mxu0 %v2558_v25  ;;  %2599 = vmatprep.subr.bf16.mxu1 %v3401_v57  ;;  %v3745_v25 = vand.u32 4294901760, %v3319_v39  ;;  %v3752_v39 = vand.u32 4294901760, %v3393_v44 }
 0x1d0   :  { %2561 = vmatpush3.bf16.msra.mxu0 %v2560_v36  ;;  %2601 = vmatpush3.bf16.msra.mxu1 %v3414_v31 }
 0x1d1   :  { %2563 = vmatprep.subr.bf16.mxu0 %v2562_v34  ;;  %2603 = vmatprep.subr.bf16.mxu1 %v3428_v9 }
 0x1d4   :  { %2565 = vmatpush3.bf16.msra.mxu0 %v2564_v40  ;;  %2605 = vmatpush3.bf16.msra.mxu1 %v3434_v35 }
 0x1d5   :  { %2567 = vmatprep.subr.bf16.mxu0 %v2566_v20  ;;  %2607 = vmatprep.subr.bf16.mxu1 %v3438_v27  ;;  %v3721_v20 = vand.u32 4294901760, %v2951_v17  ;;  %v3725_v17 = vand.u32 4294901760, %v2974_v24  ;;  %v3730_v24 = vand.u32 4294901760, %v3058_v58  ;;  %v3736_v58 = vand.u32 4294901760, %v3716_v51 }
 0x1d8   :  { %2569 = vmatpush3.bf16.msra.mxu0 %v2568_v45  ;;  %2609 = vmatpush3.bf16.msra.mxu1 %v3442_v7  ;;  %v3722_v45 = vand.u32 4294901760, %v2959_v21  ;;  %v3726_v21 = vand.u32 4294901760, %v2985_v28  ;;  %v3731_v28 = vand.u32 4294901760, %v3091_v47  ;;  %v3738_v47 = vand.u32 4294901760, %v3718_v19 }
 0x1d9   :  { %2571 = vmatprep.subr.bf16.mxu0 %v2570_v14  ;;  %2643 = vmatprep.subr.bf16.mxu1 %v3115_v53  ;;  %v3723_v53 = vand.u32 4294901760, %v2964_v22  ;;  %v3728_v22 = vand.u32 4294901760, %v3008_v38  ;;  %v3734_v38 = vand.u32 4294901760, %v3127_v37  ;;  %v3740_v37 = vand.u32 4294901760, %v3720_v8 }
 0x1da   :  { %v2610_v14 = vpack.c.bf16 %v3722_v45, %v3721_v20 }
 0x1db   :  { %1704 = vmatmul.mubr.f32.vlgmr.msra.gmra.mrb[4].mxu1 %v1223_v12 }
 0x1dc   :  { %2573 = vmatpush3.bf16.msra.mxu0 %v2572_v62  ;;  %2645 = vmatpush3.bf16.msra.mxu1 %v3139_v0  ;;  %v3724_v0 = vand.u32 4294901760, %v2969_v23  ;;  %v3729_v23 = vand.u32 4294901760, %v3053_v56  ;;  %v3735_v56 = vand.u32 4294901760, %v3715_v3 }
 0x1dd   :  { %1974 = vmatprep.mubr.f32.mxu1 %v3459_v16  ;;  %2575 = vmatprep.subr.bf16.mxu0 %v2574_v55  ;;  %v2614_v55 = vpack.c.bf16 %v3726_v21, %v3725_v17 }
 0x1de   :  { %2647 = vmatprep.subr.bf16.mxu1 %v3164_v11  ;;  %v2612_v62 = vpack.c.bf16 %v3724_v0, %v3723_v53  ;;  %v3727_v11 = vand.u32 4294901760, %v2990_v29  ;;  %v3733_v29 = vand.u32 4294901760, %v3122_v59  ;;  %v3739_v59 = vand.u32 4294901760, %v3719_v42 }
 0x1e0   :  { %2577 = vmatpush3.bf16.msra.mxu0 %v2576_v41  ;;  %2649 = vmatpush3.bf16.msra.mxu1 %v3197_v63  ;;  %v2616_v63 = vpack.c.bf16 %v3728_v22, %v3727_v11  ;;  %v3741_v41 = vand.u32 4294901760, %v3277_v1  ;;  %v3747_v1 = vand.u32 4294901760, %v3335_v18 }
 0x1e1   :  { %2611 = vmatprep.subr.bf16.mxu0 %v2610_v14  ;;  %2651 = vmatprep.subr.bf16.mxu1 %v3211_v26  ;;  %v2618_v26 = vpack.c.bf16 %v3730_v24, %v3729_v23 }
 0x1e3   :  { %1596 = vmatmul.mubr.f32.vlgmr.msra.gmra.mrb[4].mxu0 %v3465_v60  ;;  %v3732_v60 = vand.u32 4294901760, %v3105_v52  ;;  %v3737_v52 = vand.u32 4294901760, %v3717_v54 }
 0x1e4   :  { %2613 = vmatpush3.bf16.msra.mxu0 %v2612_v62  ;;  %1870 = vmatprep.mubr.f32.mxu0 %v3459_v16 }
 0x1e5   :  { %2653 = vmatpush3.bf16.msra.mxu1 %v3241_v4  ;;  %2615 = vmatprep.subr.bf16.mxu0 %v2614_v55  ;;  %v2620_v16 = vpack.c.bf16 %v3732_v60, %v3731_v28  ;;  %v2622_v4 = vpack.c.bf16 %v3734_v38, %v3733_v29 }
 0x1e6   :  { %2655 = vmatprep.subr.bf16.mxu1 %v3350_v32  ;;  %v2624_v32 = vpack.c.bf16 %v3736_v58, %v3735_v56 }
 0x1e8   :  { %2617 = vmatpush3.bf16.msra.mxu0 %v2616_v63 }
 0x1e9   :  { %2657 = vmatpush3.bf16.msra.mxu1 %v3362_v6  ;;  %2619 = vmatprep.subr.bf16.mxu0 %v2618_v26  ;;  %v2626_v6 = vpack.c.bf16 %v3738_v47, %v3737_v52 }
 0x1ea   :  { %2659 = vmatprep.subr.bf16.mxu1 %v3376_v43  ;;  %v2628_v43 = vpack.c.bf16 %v3740_v37, %v3739_v59 }
 0x1ec   :  { %2621 = vmatpush3.bf16.msra.mxu0 %v2620_v16 }
 0x1ed   :  { %2661 = vmatpush3.bf16.msra.mxu1 %v3387_v48  ;;  %2623 = vmatprep.subr.bf16.mxu0 %v2622_v4  ;;  %v3742_v48 = vand.u32 4294901760, %v3282_v49  ;;  %v3748_v49 = vand.u32 4294901760, %v3340_v30 }
 0x1ee   :  { %2663 = vmatprep.subr.bf16.mxu1 %v3401_v57  ;;  %v3744_v57 = vand.u32 4294901760, %v3292_v61  ;;  %v3750_v61 = vand.u32 4294901760, %v3380_v46 }
 0x1ef   :  { %v2630_v12 = vpack.c.bf16 %v3742_v48, %v3741_v41 }
 0x1f0   :  { %2625 = vmatpush3.bf16.msra.mxu0 %v2624_v32  ;;  %v2632_v2 = vpack.c.bf16 %v3744_v57, %v3743_v10 }
 0x1f1   :  { %2665 = vmatpush3.bf16.msra.mxu1 %v3414_v31  ;;  %2627 = vmatprep.subr.bf16.mxu0 %v2626_v6  ;;  %v3746_v31 = vand.u32 4294901760, %v3324_v15  ;;  %v3751_v15 = vand.u32 4294901760, %v3389_v33 }
 0x1f2   :  { %2667 = vmatprep.subr.bf16.mxu1 %v3428_v9  ;;  %v2636_v9 = vpack.c.bf16 %v3748_v49, %v3747_v1 }
 0x1f3   :  { %v2634_v3 = vpack.c.bf16 %v3746_v31, %v3745_v25 }
 0x1f4   :  { %2629 = vmatpush3.bf16.msra.mxu0 %v2628_v43 }
 0x1f5   :  { %2669 = vmatpush3.bf16.msra.mxu1 %v3434_v35  ;;  %2631 = vmatprep.subr.bf16.mxu0 %v2630_v12  ;;  %v2638_v35 = vpack.c.bf16 %v3750_v61, %v3749_v50 }
 0x1f6   :  { %2671 = vmatprep.subr.bf16.mxu1 %v3438_v27  ;;  %v2640_v27 = vpack.c.bf16 %v3752_v39, %v3751_v15 }
 0x1f8   :  { %2633 = vmatpush3.bf16.msra.mxu0 %v2632_v2 }
 0x1f9   :  { %2673 = vmatpush3.bf16.msra.mxu1 %v3442_v7  ;;  %2635 = vmatprep.subr.bf16.mxu0 %v2634_v3 }
 0x1fc   :  { %1976 = vmatmul.mubr.f32.vlgmr.msra.gmra.mrb[6].mxu1 %v3461_v13  ;;  %2637 = vmatpush3.bf16.msra.mxu0 %v2636_v9 }
 0x1fd   :  { %2639 = vmatprep.subr.bf16.mxu0 %v2638_v35 }
 0x200   :  { %2641 = vmatpush3.bf16.msra.mxu0 %v2640_v27 }
 0x203   :  { %1872 = vmatmul.mubr.f32.vlgmr.msra.gmra.mrb[6].mxu0 %v3461_v13 }
 0x28e   :  { %v2135_v18 = vpop.f32.mrb[2].mxu1 }
 0x28f   :  { %v2136_v30 = vpop.f32.mrb[3].mxu1 }
 0x290   :  { %v2137_v7 = vadd.f32 %v2136_v30, %v2135_v18 }
 0x296   :  { %v2100_v51 = vpop.f32.mrb[2].mxu0 }
 0x297   :  { %v2101_v5 = vpop.f32.mrb[3].mxu0 }
 0x298   :  { %v2102_v36 = vadd.f32 %v2101_v5, %v2100_v51 }
 0x29a   :  { %v1460_v46 = vadd.f32 %v2137_v7, %v2102_v36 }
 0x2ae   :  { %v2205_v54 = vpop.f32.mrb[4].mxu1 }
 0x2af   :  { %v2206_v19 = vpop.f32.mrb[5].mxu1 }
 0x2b0   :  { %v2207_v34 = vadd.f32 %v2206_v19, %v2205_v54 }
 0x2b6   :  { %v2170_v42 = vpop.f32.mrb[4].mxu0 }
 0x2b7   :  { %v2171_v8 = vpop.f32.mrb[5].mxu0 }
 0x2b8   :  { %v2172_v33 = vadd.f32 %v2171_v8, %v2170_v42 }
 0x2ba   :  { %v1598_v40 = vadd.f32 %v2172_v33, %v1460_v46 }
 0x2bc   :  { %v1706_v44 = vadd.f32 %v2207_v34, %v1598_v40 }
 0x2cf   :  { %v2275_v20 = vpop.f32.mrb[6].mxu1 }
 0x2d0   :  { %v2276_v45 = vpop.f32.mrb[7].mxu1 }
 0x2d1   :  { %v2277_v14 = vadd.f32 %v2276_v45, %v2275_v20 }
 0x2d6   :  { %v2240_v53 = vpop.f32.mrb[6].mxu0 }
 0x2d7   :  { %v2241_v13 = vpop.f32.mrb[7].mxu0 }
 0x2d8   :  { %v2242_v0 = vadd.f32 %v2241_v13, %v2240_v53 }
 0x2da   :  { %v1874_v62 = vadd.f32 %v2242_v0, %v1706_v44 }
 0x2dc   :  { %v1978_v17 = vadd.f32 %v2277_v14, %v1874_v62 }
 0x2de   :  { %1981 = vst [vmem:[#allocation7] sm:$0xff] %v1978_v17 }
 0x2df   :  { %2763 = shalt.err (!%p2760_p6)
}
 0x2e0   :  { %s2764_s25 = scalar_lea.hbm %s3624_s5, 128 }
 0x2e1   :  { %p2765_p7 = scmp.ne.s32.totalorder %s3624_s5, %s2764_s25  ;;  %p2768_p8 = scmp.lt.u32.totalorder %s2764_s25, %s3624_s5 }
 0x2e3   :  { %p2770_p9 = pnand %p2768_p8, %p2765_p7 }
 0x2e5   :  { %2773 = shalt.err (!%p2770_p9)
}
 0x2e6   :  { %1991 = dma.vmem_to_hbm [thread:$0]  %s1989_s3, 128, %s3624_s5, [#allocation4]  }
 0x2e7   :  { %2778 = dma.done.wait [#allocation4], 128  }
 0x2e8   :  { %2779 = vsyncadd [#allocation4], 4294967168 }
 0x2e9   :  { %1995 = vsyncpa [#allocation3], 1 }
 0x2ea   :  { %1996 = vsyncpa [#allocation6], 1 }
 0x2eb   :  { %1997 = vsyncpa [#allocation4], 1 }

</bundles_post_ra>
